<compile_context>
chip_gen: v6e
topology: v6e:2x2x1
jax: 0.10.0
libtpu: 0.0.40
codegen_flags: <defaults>
</compile_context>

<pallas_src>
import functools

import jax
import jax.numpy as jnp
from jax.experimental import pallas as pl
from jax.experimental.pallas import tpu as pltpu


_LANE = 128      # vreg lane width  -> padding target for last dims
_SUBLANE = 8     # vreg sublane     -> padding target for second-to-last dims
_SCORE_COL = 4   # column 4 holds the objectness score (cols 0..3 = xyxy box)


def _round_up(x, m):
    return ((x + m - 1) // m) * m


# ----------------------------- Pallas kernel ------------------------------- #
def _vit_head_kernel(x_ref, w1_ref, b1_ref, w2_ref, b2_ref, o_ref):
    """One row-tile of the fused head:
       (patches @ W_embed + b1) -> GELU -> (@ W_head + b2) -> sigmoid(score col).
       Matmul operands are bf16 (MXU), accumulation / elementwise is f32."""
    x = x_ref[...]                                                   # [TM, DPp]  bf16
    h = jnp.dot(x, w1_ref[...], preferred_element_type=jnp.float32)  # MXU -> f32
    h = h + b1_ref[...]                                              # [TM, Hp]   f32
    h = jax.nn.gelu(h)                                               # tanh-approx GELU (EUP)
    o = jnp.dot(h.astype(jnp.bfloat16), w2_ref[...],
                preferred_element_type=jnp.float32)                  # [TM, Op]   f32
    o = o + b2_ref[...]
    # Fused sigmoid on the score column only (boxes stay raw, like the reference).
    lane = jax.lax.broadcasted_iota(jnp.int32, o.shape, 1)
    o = jnp.where(lane == _SCORE_COL, jax.nn.sigmoid(o), o)
    o_ref[...] = o


def vit_head(patches, w_embed, b_embed, w_head, b_head, *, tm=128):
    """patches [N, Dp] f32 -> raw head output [N, out_dim] f32 (score col sigmoided)."""
    n, dp = patches.shape
    hid = w_embed.shape[1]
    out = w_head.shape[1]

    # Lane/sublane-dense padded shapes.
    dp_p = _round_up(dp, _LANE)
    hid_p = _round_up(hid, _LANE)
    out_p = _round_up(out, _LANE)
    tm = _round_up(min(tm, _round_up(n, _SUBLANE)), _SUBLANE)
    n_p = _round_up(n, tm)

    # Zero padding keeps real rows/cols numerically identical (gelu(0)=0, zero
    # weight rows/cols contribute nothing); padded biases are zero explicitly.
    x = jnp.pad(patches, ((0, n_p - n), (0, dp_p - dp))).astype(jnp.bfloat16)
    w1 = jnp.pad(w_embed, ((0, dp_p - dp), (0, hid_p - hid))).astype(jnp.bfloat16)
    b1 = jnp.pad(b_embed.reshape(1, -1), ((0, 0), (0, hid_p - hid))).astype(jnp.float32)
    w2 = jnp.pad(w_head, ((0, hid_p - hid), (0, out_p - out))).astype(jnp.bfloat16)
    b2 = jnp.pad(b_head.reshape(1, -1), ((0, 0), (0, out_p - out))).astype(jnp.float32)

    grid = (n_p // tm,)
    cost = pl.CostEstimate(
        flops=2 * n_p * (dp_p * hid_p + hid_p * out_p),
        transcendentals=n_p * (hid_p + out_p),
        bytes_accessed=(x.size * 2 + w1.size * 2 + w2.size * 2
                        + b1.size * 4 + b2.size * 4 + n_p * out_p * 4),
    )

    raw = pl.pallas_call(
        _vit_head_kernel,
        out_shape=jax.ShapeDtypeStruct((n_p, out_p), jnp.float32),
        grid=grid,
        in_specs=[
            pl.BlockSpec((tm, dp_p), lambda i: (i, 0)),     # row-tiled, double-buffered
            pl.BlockSpec((dp_p, hid_p), lambda i: (0, 0)),  # weights stay VMEM-resident
            pl.BlockSpec((1, hid_p), lambda i: (0, 0)),
            pl.BlockSpec((hid_p, out_p), lambda i: (0, 0)),
            pl.BlockSpec((1, out_p), lambda i: (0, 0)),
        ],
        out_specs=pl.BlockSpec((tm, out_p), lambda i: (i, 0)),
        compiler_params=pltpu.CompilerParams(
            dimension_semantics=("parallel",),
            vmem_limit_bytes=32 * 1024 * 1024,
        ),
        cost_estimate=cost,
    )(x, w1, b1, w2, b2)

    return raw[:n, :out]


# ------------------------------- glue code --------------------------------- #
def patchify_chw(img_chw, patch):
    """[C, H, W] -> [num_patches, C*patch*patch], channel-major within a patch."""
    c, h, w = img_chw.shape
    x = img_chw.reshape(c, h // patch, patch, w // patch, patch)
    x = jnp.transpose(x, (1, 3, 0, 2, 4))          # [H/p, W/p, C, p, p]
    return x.reshape((h // patch) * (w // patch), c * patch * patch)


@functools.partial(jax.jit, static_argnames=("patch",))
def model_forward(image_chw, w_embed, b_embed, w_head, b_head, patch=4):
    """Synthetic 'self.model([{"image": images}])': patchify -> fused Pallas head."""
    patches = patchify_chw(image_chw, patch)                       # [N, Dp]
    raw = vit_head(patches, w_embed, b_embed, w_head, b_head)      # [N, 5]
    pred_boxes = raw[:, :_SCORE_COL]                               # xyxy (synthetic)
    scores = raw[:, _SCORE_COL]                                    # sigmoid fused in-kernel
    return pred_boxes, scores


def make_params(key, c, patch, hidden, out_dim):
    k1, k2, k3, k4 = jax.random.split(key, 4)
    dp = c * patch * patch
    w_embed = jax.random.normal(k1, (dp, hidden), jnp.float32) * 0.02
    b_embed = jax.random.normal(k2, (hidden,), jnp.float32) * 0.02
    w_head = jax.random.normal(k3, (hidden, out_dim), jnp.float32) * 0.02
    b_head = jax.random.normal(k4, (out_dim,), jnp.float32) * 0.02
    return w_embed, b_embed, w_head, b_head


def experiments_forward(dataloader, params, patch=4):
    """Mirrors Experiments.forward: iterate, squeeze(0), run model, print, break."""
    w_embed, b_embed, w_head, b_head = params
    outputs = None
    for batch_index, images in enumerate(dataloader):
        images = jnp.squeeze(images, axis=0)                       # [C, H, W]
        pred_boxes, scores = model_forward(
            images, w_embed, b_embed, w_head, b_head, patch=patch)
        outputs = {"pred_boxes": pred_boxes, "scores": scores}
        print({k: (v.shape, str(v.dtype)) for k, v in outputs.items()})
        break                                  # same as PyTorch: first batch only
    return outputs


# --------------------------------- main ------------------------------------ #
if __name__ == "__main__":
    key = jax.random.PRNGKey(0)
    k_data, k_param = jax.random.split(key)

    # "dataloader": 2 items, each shaped [1, C, H, W] like the PyTorch loop expects.
    C, H, W, PATCH, HIDDEN, OUT = 3, 64, 64, 4, 64, 5
    dataloader = [
        jax.random.normal(jax.random.fold_in(k_data, i), (1, C, H, W), jnp.float32)
        for i in range(2)
    ]

    params = make_params(k_param, C, PATCH, HIDDEN, OUT)

    outputs = experiments_forward(dataloader, params, patch=PATCH)
    jax.block_until_ready(outputs["pred_boxes"])
    jax.block_until_ready(outputs["scores"])

    # sanity: (H/4)*(W/4) patches, 4 box coords each, one score per patch in (0,1)
    n_patches = (H // PATCH) * (W // PATCH)
    assert outputs["pred_boxes"].shape == (n_patches, 4)
    assert outputs["scores"].shape == (n_patches,)
    assert bool(jnp.all((outputs["scores"] > 0.0) & (outputs["scores"] < 1.0)))
    print("KERNEL_OK")
</pallas_src>

<mosaic_0001>
module attributes {stable_mosaic.version = 11 : i64} {
  func.func @_vit_head_kernel(%arg0: i32, %arg1: memref<128x128xbf16, #tpu.memory_space<vmem>>, %arg2: memref<128x128xbf16, #tpu.memory_space<vmem>>, %arg3: memref<1x128xf32, #tpu.memory_space<vmem>>, %arg4: memref<128x128xbf16, #tpu.memory_space<vmem>>, %arg5: memref<1x128xf32, #tpu.memory_space<vmem>>, %arg6: memref<128x128xf32, #tpu.memory_space<vmem>>) attributes {dimension_semantics = [#tpu.dimension_semantics<parallel>], iteration_bounds = array<i64: 2>, scalar_prefetch = 0 : i64, scratch_operands = 0 : i64, tpu.core_type = #tpu.core_type<tc>, window_params = [{transform_indices = @transform_0, window_bounds = array<i64: 128, 128>}, {pipeline_mode = #tpu.pipeline_mode<synchronous>, transform_indices = @transform_1, window_bounds = array<i64: 128, 128>}, {pipeline_mode = #tpu.pipeline_mode<synchronous>, transform_indices = @transform_2, window_bounds = array<i64: 1, 128>}, {pipeline_mode = #tpu.pipeline_mode<synchronous>, transform_indices = @transform_3, window_bounds = array<i64: 128, 128>}, {pipeline_mode = #tpu.pipeline_mode<synchronous>, transform_indices = @transform_4, window_bounds = array<i64: 1, 128>}, {transform_indices = @transform_5, window_bounds = array<i64: 128, 128>}]} {
    %c0 = arith.constant 0 : index
    %c0_0 = arith.constant 0 : index
    %0 = vector.load %arg1[%c0, %c0_0] : memref<128x128xbf16, #tpu.memory_space<vmem>>, vector<128x128xbf16>
    %c0_1 = arith.constant 0 : index
    %c0_2 = arith.constant 0 : index
    %1 = vector.load %arg2[%c0_1, %c0_2] : memref<128x128xbf16, #tpu.memory_space<vmem>>, vector<128x128xbf16>
    %cst = arith.constant dense<0.000000e+00> : vector<128x128xf32>
    %2 = tpu.matmul %0, %1, %cst {dimension_numbers = #tpu.dot_dimension_numbers<[1], [0], [0], [1], [0, 0, 1, 1], [], []>} : vector<128x128xbf16>, vector<128x128xbf16>, vector<128x128xf32> -> vector<128x128xf32>
    %c0_3 = arith.constant 0 : index
    %c0_4 = arith.constant 0 : index
    %3 = vector.load %arg3[%c0_3, %c0_4] : memref<1x128xf32, #tpu.memory_space<vmem>>, vector<1x128xf32>
    %4 = vector.broadcast %3 : vector<1x128xf32> to vector<128x128xf32>
    %5 = arith.addf %2, %4 : vector<128x128xf32>
    %6 = arith.mulf %5, %5 : vector<128x128xf32>
    %7 = arith.mulf %5, %6 : vector<128x128xf32>
    %cst_5 = arith.constant 4.471500e-02 : f32
    %8 = vector.broadcast %cst_5 : f32 to vector<128x128xf32>
    %9 = arith.mulf %8, %7 : vector<128x128xf32>
    %10 = arith.addf %5, %9 : vector<128x128xf32>
    %cst_6 = arith.constant 0.797884583 : f32
    %11 = vector.broadcast %cst_6 : f32 to vector<128x128xf32>
    %12 = arith.mulf %11, %10 : vector<128x128xf32>
    %13 = math.tanh %12 : vector<128x128xf32>
    %cst_7 = arith.constant 1.000000e+00 : f32
    %14 = vector.broadcast %cst_7 : f32 to vector<128x128xf32>
    %15 = arith.addf %14, %13 : vector<128x128xf32>
    %cst_8 = arith.constant 5.000000e-01 : f32
    %16 = vector.broadcast %cst_8 : f32 to vector<128x128xf32>
    %17 = arith.mulf %16, %15 : vector<128x128xf32>
    %18 = arith.mulf %5, %17 : vector<128x128xf32>
    %19 = arith.truncf %18 : vector<128x128xf32> to vector<128x128xbf16>
    %c0_9 = arith.constant 0 : index
    %c0_10 = arith.constant 0 : index
    %20 = vector.load %arg4[%c0_9, %c0_10] : memref<128x128xbf16, #tpu.memory_space<vmem>>, vector<128x128xbf16>
    %cst_11 = arith.constant dense<0.000000e+00> : vector<128x128xf32>
    %21 = tpu.matmul %19, %20, %cst_11 {dimension_numbers = #tpu.dot_dimension_numbers<[1], [0], [0], [1], [0, 0, 1, 1], [], []>} : vector<128x128xbf16>, vector<128x128xbf16>, vector<128x128xf32> -> vector<128x128xf32>
    %c0_12 = arith.constant 0 : index
    %c0_13 = arith.constant 0 : index
    %22 = vector.load %arg5[%c0_12, %c0_13] : memref<1x128xf32, #tpu.memory_space<vmem>>, vector<1x128xf32>
    %23 = vector.broadcast %22 : vector<1x128xf32> to vector<128x128xf32>
    %24 = arith.addf %21, %23 : vector<128x128xf32>
    %25 = tpu.iota {dimensions = array<i32: 1>} : vector<128x128xi32>
    %c4_i32 = arith.constant 4 : i32
    %26 = vector.broadcast %c4_i32 : i32 to vector<128x128xi32>
    %27 = arith.cmpi eq, %25, %26 : vector<128x128xi32>
    %28 = arith.negf %24 : vector<128x128xf32>
    %29 = math.exp %28 : vector<128x128xf32>
    %cst_14 = arith.constant 1.000000e+00 : f32
    %30 = vector.broadcast %cst_14 : f32 to vector<128x128xf32>
    %31 = arith.addf %30, %29 : vector<128x128xf32>
    %32 = arith.divf %30, %31 : vector<128x128xf32>
    %33 = arith.select %27, %32, %24 : vector<128x128xi1>, vector<128x128xf32>
    %c0_15 = arith.constant 0 : index
    %c0_16 = arith.constant 0 : index
    %34 = vector.load %arg6[%c0_15, %c0_16] : memref<128x128xf32, #tpu.memory_space<vmem>>, vector<128x128xf32>
    tpu.vector_store %arg6[%c0_15, %c0_16], %33 {strides = array<i32>} : memref<128x128xf32, #tpu.memory_space<vmem>>, vector<128x128xf32>,
    return
  }
  func.func @transform_0(%arg0: i32) -> (i32, i32) {
    %c0_i32 = arith.constant 0 : i32
    %c0_i32_0 = arith.constant 0 : i32
    return %arg0, %c0_i32 : i32, i32
  }
  func.func @transform_1(%arg0: i32) -> (i32, i32) {
    %c0_i32 = arith.constant 0 : i32
    %c0_i32_0 = arith.constant 0 : i32
    %c0_i32_1 = arith.constant 0 : i32
    return %c0_i32, %c0_i32_0 : i32, i32
  }
  func.func @transform_2(%arg0: i32) -> (i32, i32) {
    %c0_i32 = arith.constant 0 : i32
    %c0_i32_0 = arith.constant 0 : i32
    %c0_i32_1 = arith.constant 0 : i32
    return %c0_i32, %c0_i32_0 : i32, i32
  }
  func.func @transform_3(%arg0: i32) -> (i32, i32) {
    %c0_i32 = arith.constant 0 : i32
    %c0_i32_0 = arith.constant 0 : i32
    %c0_i32_1 = arith.constant 0 : i32
    return %c0_i32, %c0_i32_0 : i32, i32
  }
  func.func @transform_4(%arg0: i32) -> (i32, i32) {
    %c0_i32 = arith.constant 0 : i32
    %c0_i32_0 = arith.constant 0 : i32
    %c0_i32_1 = arith.constant 0 : i32
    return %c0_i32, %c0_i32_0 : i32, i32
  }
  func.func @transform_5(%arg0: i32) -> (i32, i32) {
    %c0_i32 = arith.constant 0 : i32
    %c0_i32_0 = arith.constant 0 : i32
    return %arg0, %c0_i32 : i32, i32
  }
}

</mosaic_0001>

<bundles_post_ra>
// kernel: model_forward.1
= control target key start
LH: loop header
LB: loop body
LE: loop exit
PB: predicated region body
PF: predicated region fallthrough
CT: control target
= control target key end

     0   :  { %s1283_s18 = smov 0   ;;  %s1633_s0 = inlined_call_operand.vmem [shape: bf16[256,128], index: 0, kind: input, shape index: {}]   ;;  %s1634_s1 = inlined_call_operand.vmem [shape: bf16[128,128], index: 1, kind: input, shape index: {}]   ;;  %s1635_s2 = inlined_call_operand.vmem [shape: f32[1,128], index: 2, kind: input, shape index: {}]   ;;  %s1636_s3 = inlined_call_operand.vmem [shape: bf16[128,128], index: 3, kind: input, shape index: {}]   ;;  %s1637_s4 = inlined_call_operand.vmem [shape: f32[1,128], index: 4, kind: input, shape index: {}]   ;;  %s1638_s5 = inlined_call_operand.vmem [shape: f32[256,128], index: 5, kind: output, shape index: {}]  }
   0x1 LB: > { %s968_s19 = sadd.s32 4294967295, %s1251_s18   ;;  %p972_p0 = scmp.ge.s32.totalorder %s1251_s18, 1  ;;  %s1251_s18 = sphi %s1283_s18, %s15_s18  }
   0x2   : > { %p188_p1 = scmp.lt.s32.totalorder %s1251_s18, 3 }
   0x4   : > { %p189_p2 = pnand %p972_p0, %p188_p1 }
   0x5   : > { %s973_s22 = sshll.u32 (!%p189_p2), %s968_s19, 4 }
   0x6   : > { %192 = sbr.rel (%p189_p2) target bundleno = 539 (0x21b), region = 40  ;;  %p217_p3 = scmp.lt.s32.totalorder (!%p189_p2), %s973_s22, 31 }
   0xb   : > { %v1125_v0 = vld [vmem:[%s1634_s1 + $0x38] sm:$0xff]   ;;  %v1126_v1 = vld [vmem:[%s1634_s1 + $0x30] sm:$0xff]   ;;  %s1640_s22 = smov (!%p217_p3, %s973_s22), 31  ;;  %v1127_v2 = vld [vmem:[%s1634_s1 + $0x28] sm:$0xff]  }
   0xc   : > { %1053 = vmatprep.subr.bf16.mxu0 %v1125_v0  ;;  %s974_s27 = sshll.u32 %s1640_s22, 2  ;;  %v1128_v3 = vld [vmem:[%s1634_s1 + $0x20] sm:$0xff]   ;;  %v1129_v5 = vld [vmem:[%s1634_s1 + $0x18] sm:$0xff]   ;;  %v1130_v6 = vld [vmem:[%s1634_s1 + $0x10] sm:$0xff]   ;;  %s976_s13 = sshll.u32 %s1640_s22, 3 }
   0xd   : > { %1054 = vmatpush3.bf16.msra.mxu0 %v1125_v0  ;;  %s1306_s30 = scalar_lea.vmem %s1633_s0, %s974_s27  ;;  %v1131_v7 = vld [vmem:[%s1634_s1 + $0x8] sm:$0xff]   ;;  %v1132_v8 = vld [vmem:[%s1634_s1] sm:$0xff]   ;;  %v1141_v16 = vld [vmem:[%s1636_s3 + $0x38] sm:$0xff]   ;;  %s1563_s16 = scalar_lea.vmem %s1638_s5, %s976_s13 }
   0xe   : > { %1055 = vmatprep.subr.bf16.mxu0 %v1126_v1  ;;  %v1133_v4 = vld [vmem:[%s1306_s30] sm:$0xff]   ;;  %v1134_v9 = vld [vmem:[%s1306_s30 + $0x8] sm:$0xff]   ;;  %v1135_v10 = vld [vmem:[%s1306_s30 + $0x10] sm:$0xff]   ;;  %1085 = vmatprep.subr.bf16.mxu1 %v1141_v16 }
   0xf   : > { %1069 = vmatprep.mubr.bf16.mxu0 %v1133_v4  ;;  %v1136_v11 = vld [vmem:[%s1306_s30 + $0x18] sm:$0xff]   ;;  %v1137_v12 = vld [vmem:[%s1306_s30 + $0x20] sm:$0xff]   ;;  %v1138_v13 = vld [vmem:[%s1306_s30 + $0x28] sm:$0xff]   ;;  %1086 = vmatpush3.bf16.msra.mxu1 %v1141_v16 }
  0x10   : > { %v1139_v14 = vld [vmem:[%s1306_s30 + $0x30] sm:$0xff]   ;;  %v1140_v15 = vld [vmem:[%s1306_s30 + $0x38] sm:$0xff]   ;;  %v1143_v18 = vld [vmem:[%s1636_s3 + $0x28] sm:$0xff]  }
  0x11   : > { %1056 = vmatpush3.bf16.msra.mxu0 %v1126_v1  ;;  %v1142_v17 = vld [vmem:[%s1636_s3 + $0x30] sm:$0xff]   ;;  %v1144_v19 = vld [vmem:[%s1636_s3 + $0x20] sm:$0xff]   ;;  %v1145_v20 = vld [vmem:[%s1636_s3 + $0x18] sm:$0xff]  }
  0x12   : > { %1057 = vmatprep.subr.bf16.mxu0 %v1127_v2  ;;  %1087 = vmatprep.subr.bf16.mxu1 %v1142_v17  ;;  %v1146_v21 = vld [vmem:[%s1636_s3 + $0x10] sm:$0xff]   ;;  %v1147_v22 = vld [vmem:[%s1636_s3 + $0x8] sm:$0xff]   ;;  %v1148_v23 = vld [vmem:[%s1636_s3] sm:$0xff]  }
  0x13   : > { %1088 = vmatpush3.bf16.msra.mxu1 %v1142_v17  ;;  %v1358_v24 = vld [vmem:[%s1635_s2] ss:$0 sm:$0xff] }
  0x14   : > { %1089 = vmatprep.subr.bf16.mxu1 %v1143_v18 }
  0x15   : > { %1058 = vmatpush3.bf16.msra.mxu0 %v1127_v2 }
  0x16   : > { %1059 = vmatprep.subr.bf16.mxu0 %v1128_v3 }
  0x17   : > { %1090 = vmatpush3.bf16.msra.mxu1 %v1143_v18 }
  0x18   : > { %1091 = vmatprep.subr.bf16.mxu1 %v1144_v19 }
  0x19   : > { %1060 = vmatpush3.bf16.msra.mxu0 %v1128_v3 }
  0x1a   : > { %1061 = vmatprep.subr.bf16.mxu0 %v1129_v5 }
  0x1b   : > { %1092 = vmatpush3.bf16.msra.mxu1 %v1144_v19 }
  0x1c   : > { %1093 = vmatprep.subr.bf16.mxu1 %v1145_v20 }
  0x1d   : > { %1062 = vmatpush3.bf16.msra.mxu0 %v1129_v5 }
  0x1e   : > { %1063 = vmatprep.subr.bf16.mxu0 %v1130_v6 }
  0x1f   : > { %1094 = vmatpush3.bf16.msra.mxu1 %v1145_v20 }
  0x20   : > { %1095 = vmatprep.subr.bf16.mxu1 %v1146_v21 }
  0x21   : > { %1064 = vmatpush3.bf16.msra.mxu0 %v1130_v6 }
  0x22   : > { %1065 = vmatprep.subr.bf16.mxu0 %v1131_v7 }
  0x23   : > { %1096 = vmatpush3.bf16.msra.mxu1 %v1146_v21 }
  0x24   : > { %1097 = vmatprep.subr.bf16.mxu1 %v1147_v22 }
  0x25   : > { %1066 = vmatpush3.bf16.msra.mxu0 %v1131_v7 }
  0x26   : > { %1067 = vmatprep.subr.bf16.mxu0 %v1132_v8 }
  0x27   : > { %1098 = vmatpush3.bf16.msra.mxu1 %v1147_v22 }
  0x28   : > { %1099 = vmatprep.subr.bf16.mxu1 %v1148_v23 }
  0x29   : > { %1068 = vmatpush3.bf16.msra.mxu0 %v1132_v8 }
  0x2b   : > { %1100 = vmatpush3.bf16.msra.mxu1 %v1148_v23 }
  0x2c   : > { %1070 = vmatmul.mubr.bf16.vlgmr.msra.gmra.mxu0 %v1134_v9 }
  0x2d   : > { %1073 = vmatprep.mubr.bf16.mxu0 %v1135_v10 }
  0x34   : > { %1074 = vmatmul.mubr.bf16.gmra.mxu0 %v1136_v11 }
  0x35   : > { %1077 = vmatprep.mubr.bf16.mxu0 %v1137_v12 }
  0x3c   : > { %1078 = vmatmul.mubr.bf16.gmra.mxu0 %v1138_v13 }
  0x3d   : > { %1081 = vmatprep.mubr.bf16.mxu0 %v1139_v14 }
  0x44   : > { %1082 = vmatmul.mubr.bf16.gmra.mxu0 %v1140_v15 }
  0xec   : > { %v1071_v25 = vpop.f32.mrf.mxu0 }
  0xed   : > { %v1361_v26 = vadd.f32 %v1071_v25, %v1358_v24 }
  0xee   : > { %v398_v27 = vpop.f32.mrf.mxu0 }
  0xef   : > { %v463_v28 = vmul.f32 %v1361_v26, %v1361_v26  ;;  %v1366_v29 = vadd.f32 %v1358_v24, %v398_v27 }
  0xf0   : > { %v1072_v30 = vpop.f32.mrf.mxu0 }
  0xf1   : > { %v479_v31 = vmul.f32 %v463_v28, %v1361_v26  ;;  %v461_v32 = vmul.f32 %v1366_v29, %v1366_v29  ;;  %v1372_v33 = vadd.f32 %v1072_v30, %v1358_v24 }
  0xf2   : > { %v401_v34 = vpop.f32.mrf.mxu0 }
  0xf3   : > { %v495_v35 = vmul.f32 0.044715, %v479_v31  ;;  %v477_v36 = vmul.f32 %v461_v32, %v1366_v29  ;;  %v464_v37 = vmul.f32 %v1372_v33, %v1372_v33  ;;  %v1378_v38 = vadd.f32 %v1358_v24, %v401_v34 }
  0xf4   : > { %v1075_v39 = vpop.f32.mrf.mxu0 }
  0xf5   : > { %v511_v40 = vadd.f32 %v495_v35, %v1361_v26  ;;  %v493_v41 = vmul.f32 0.044715, %v477_v36  ;;  %v480_v42 = vmul.f32 %v464_v37, %v1372_v33  ;;  %v462_v43 = vmul.f32 %v1378_v38, %v1378_v38 }
  0xf6   : > { %v1385_v44 = vadd.f32 %v1075_v39, %v1358_v24  ;;  %v414_v45 = vpop.f32.mrf.mxu0 }
  0xf7   : > { %v527_v46 = vmul.f32 0.7978846, %v511_v40  ;;  %v509_v47 = vadd.f32 %v493_v41, %v1366_v29  ;;  %v496_v48 = vmul.f32 0.044715, %v480_v42  ;;  %v478_v49 = vmul.f32 %v462_v43, %v1378_v38 }
  0xf8   : > { %v467_v50 = vmul.f32 %v1385_v44, %v1385_v44  ;;  %v1392_v51 = vadd.f32 %v1358_v24, %v414_v45  ;;  %v1076_v52 = vpop.f32.mrf.mxu0 }
  0xf9   : > { %1149 = vtanh.f32 %v527_v46  ;;  %v512_v53 = vadd.f32 %v496_v48, %v1372_v33  ;;  %v494_v54 = vmul.f32 0.044715, %v478_v49  ;;  %v1396_v55 = vadd.f32 %v1076_v52, %v1358_v24 }
  0xfa   : > { %v483_v56 = vmul.f32 %v467_v50, %v1385_v44  ;;  %v465_v57 = vmul.f32 %v1392_v51, %v1392_v51  ;;  %v417_v58 = vpop.f32.mrf.mxu0  ;;  %v525_v59 = vmul.f32 0.7978846, %v509_v47 }
  0xfb   : > { %v528_v60 = vmul.f32 0.7978846, %v512_v53  ;;  %v510_v61 = vadd.f32 %v494_v54, %v1378_v38  ;;  %v468_v62 = vmul.f32 %v1396_v55, %v1396_v55  ;;  %v1405_v63 = vadd.f32 %v1358_v24, %v417_v58 }
  0xfc   : > { %v499_v0 = vmul.f32 0.044715, %v483_v56  ;;  %v481_v1 = vmul.f32 %v465_v57, %v1392_v51  ;;  %v1079_v2 = vpop.f32.mrf.mxu0  ;;  %1151 = vtanh.f32 %v525_v59 }
  0xfd   : > { %1153 = vtanh.f32 %v528_v60  ;;  %v484_v3 = vmul.f32 %v468_v62, %v1396_v55  ;;  %v466_v4 = vmul.f32 %v1405_v63, %v1405_v63  ;;  %v1412_v5 = vadd.f32 %v1079_v2, %v1358_v24 }
  0xfe   : > { %v515_v6 = vadd.f32 %v499_v0, %v1385_v44  ;;  %v497_v7 = vmul.f32 0.044715, %v481_v1  ;;  %v430_v8 = vpop.f32.mrf.mxu0  ;;  %v526_v9 = vmul.f32 0.7978846, %v510_v61 }
  0xff   : > { %v500_v10 = vmul.f32 0.044715, %v484_v3  ;;  %v482_v11 = vmul.f32 %v466_v4, %v1405_v63  ;;  %v471_v12 = vmul.f32 %v1412_v5, %v1412_v5  ;;  %v1419_v13 = vadd.f32 %v1358_v24, %v430_v8 }
 0x100   : > { %v531_v14 = vmul.f32 0.7978846, %v515_v6  ;;  %v513_v15 = vadd.f32 %v497_v7, %v1392_v51  ;;  %v1080_v16 = vpop.f32.mrf.mxu0  ;;  %1155 = vtanh.f32 %v526_v9 }
 0x101   : > { %v516_v17 = vadd.f32 %v500_v10, %v1396_v55  ;;  %v498_v18 = vmul.f32 0.044715, %v482_v11  ;;  %v487_v19 = vmul.f32 %v471_v12, %v1412_v5  ;;  %v469_v20 = vmul.f32 %v1419_v13, %v1419_v13 }
 0x102   : > { %1157 = vtanh.f32 %v531_v14  ;;  %v529_v21 = vmul.f32 0.7978846, %v513_v15  ;;  %v1427_v22 = vadd.f32 %v1080_v16, %v1358_v24  ;;  %v433_v23 = vpop.f32.mrf.mxu0 }
 0x103   : > { %v532_v25 = vmul.f32 0.7978846, %v516_v17  ;;  %v514_v27 = vadd.f32 %v498_v18, %v1405_v63  ;;  %v503_v28 = vmul.f32 0.044715, %v487_v19  ;;  %v485_v30 = vmul.f32 %v469_v20, %v1419_v13 }
 0x104   : > { %1159 = vtanh.f32 %v529_v21  ;;  %v472_v31 = vmul.f32 %v1427_v22, %v1427_v22  ;;  %v1434_v32 = vadd.f32 %v1358_v24, %v433_v23  ;;  %v1083_v34 = vpop.f32.mrf.mxu0 }
 0x105   : > { %1161 = vtanh.f32 %v532_v25  ;;  %v530_v35 = vmul.f32 0.7978846, %v514_v27  ;;  %v519_v36 = vadd.f32 %v503_v28, %v1412_v5  ;;  %v501_v37 = vmul.f32 0.044715, %v485_v30 }
 0x106   : > { %v1150_v39 = vpop.eup %1149  ;;  %v488_v40 = vmul.f32 %v472_v31, %v1427_v22  ;;  %v470_v41 = vmul.f32 %v1434_v32, %v1434_v32  ;;  %v1441_v42 = vadd.f32 %v1083_v34, %v1358_v24  ;;  %v446_v43 = vpop.f32.mrf.mxu0 }
 0x107   : > { %1163 = vtanh.f32 %v530_v35  ;;  %v535_v45 = vmul.f32 0.7978846, %v519_v36  ;;  %v517_v46 = vadd.f32 %v501_v37, %v1419_v13  ;;  %v1445_v47 = vadd.f32 %v1358_v24, %v446_v43 }
 0x108   : > { %v504_v48 = vmul.f32 0.044715, %v488_v40  ;;  %v486_v49 = vmul.f32 %v470_v41, %v1434_v32  ;;  %v475_v50 = vmul.f32 %v1441_v42, %v1441_v42  ;;  %v1084_v52 = vpop.f32.mrf.mxu0  ;;  %v559_v53 = vadd.f32 1.0, %v1150_v39 }
 0x109   : > { %v1152_v54 = vpop.eup %1151  ;;  %1165 = vtanh.f32 %v535_v45  ;;  %v533_v56 = vmul.f32 0.7978846, %v517_v46  ;;  %v473_v57 = vmul.f32 %v1445_v47, %v1445_v47  ;;  %v1453_v58 = vadd.f32 %v1084_v52, %v1358_v24 }
 0x10a   : > { %v1154_v59 = vpop.eup %1153  ;;  %v520_v60 = vadd.f32 %v504_v48, %v1427_v22  ;;  %v502_v61 = vmul.f32 0.044715, %v486_v49  ;;  %v491_v62 = vmul.f32 %v475_v50, %v1441_v42  ;;  %v449_v0 = vpop.f32.mrf.mxu0  ;;  %v557_v1 = vadd.f32 1.0, %v1152_v54 }
 0x10b   : > { %1167 = vtanh.f32 %v533_v56  ;;  %v489_v2 = vmul.f32 %v473_v57, %v1445_v47  ;;  %v476_v3 = vmul.f32 %v1453_v58, %v1453_v58  ;;  %v1461_v4 = vadd.f32 %v1358_v24, %v449_v0 }
 0x10c   : > { %v536_v6 = vmul.f32 0.7978846, %v520_v60  ;;  %v518_v7 = vadd.f32 %v502_v61, %v1434_v32  ;;  %v507_v8 = vmul.f32 0.044715, %v491_v62  ;;  %v573_v9 = vmul.f32 0.5, %v557_v1 }
 0x10d   : > { %v1156_v10 = vpop.eup %1155  ;;  %v505_v11 = vmul.f32 0.044715, %v489_v2  ;;  %v492_v12 = vmul.f32 %v476_v3, %v1453_v58  ;;  %v474_v14 = vmul.f32 %v1461_v4, %v1461_v4  ;;  %v560_v15 = vadd.f32 1.0, %v1154_v59 }
 0x10e   : > { %1169 = vtanh.f32 %v536_v6  ;;  %v534_v16 = vmul.f32 0.7978846, %v518_v7  ;;  %v523_v17 = vadd.f32 %v507_v8, %v1441_v42  ;;  %v558_v18 = vadd.f32 1.0, %v1156_v10 }
 0x10f   : > { %v1158_v24 = vpop.eup %1157  ;;  %v521_v19 = vadd.f32 %v505_v11, %v1445_v47  ;;  %v508_v20 = vmul.f32 0.044715, %v492_v12  ;;  %v490_v21 = vmul.f32 %v474_v14, %v1461_v4  ;;  %v589_v23 = vmul.f32 %v573_v9, %v1366_v29 }
 0x110   : > { %1171 = vtanh.f32 %v534_v16  ;;  %v539_v25 = vmul.f32 0.7978846, %v523_v17  ;;  %v574_v27 = vmul.f32 0.5, %v558_v18  ;;  %v575_v28 = vmul.f32 0.5, %v559_v53 }
 0x111   : > { %v1160_v30 = vpop.eup %1159  ;;  %v537_v31 = vmul.f32 0.7978846, %v521_v19  ;;  %v524_v34 = vadd.f32 %v508_v20, %v1453_v58  ;;  %v506_v35 = vmul.f32 0.044715, %v490_v21  ;;  %v576_v36 = vmul.f32 0.5, %v560_v15 }
 0x112   : > { %v1162_v37 = vpop.eup %1161  ;;  %1173 = vtanh.f32 %v539_v25  ;;  %v590_v39 = vmul.f32 %v574_v27, %v1378_v38  ;;  %v591_v40 = vmul.f32 %v575_v28, %v1361_v26  ;;  %v561_v41 = vadd.f32 1.0, %v1160_v30 }
 0x113   : > { %1175 = vtanh.f32 %v537_v31  ;;  %v540_v43 = vmul.f32 0.7978846, %v524_v34  ;;  %v522_v29 = vadd.f32 %v506_v35, %v1461_v4  ;;  %v592_v45 = vmul.f32 %v576_v36, %v1372_v33 }
 0x114   : > { %v1164_v46 = vpop.eup %1163  ;;  %v605_v48 = vpack.c.bf16 %v590_v39, %v589_v23  ;;  %v577_v49 = vmul.f32 0.5, %v561_v41  ;;  %v563_v50 = vadd.f32 1.0, %v1158_v24  ;;  %v564_v52 = vadd.f32 1.0, %v1162_v37  ;;  %v1491_v37 = vld [vmem:[%s1637_s4] ss:$0 sm:$0xff] }
 0x115   : > { %1177 = vtanh.f32 %v540_v43  ;;  %v538_v53 = vmul.f32 0.7978846, %v522_v29  ;;  %v606_v54 = vpack.c.bf16 %v592_v45, %v591_v40  ;;  %v562_v56 = vadd.f32 1.0, %v1164_v46 }
 0x116   : > { %v1166_v57 = vpop.eup %1165  ;;  %1101 = vmatprep.mubr.bf16.mxu1 %v605_v48  ;;  %v580_v38 = vmul.f32 0.5, %v564_v52  ;;  %v579_v59 = vmul.f32 0.5, %v563_v50  ;;  %v593_v61 = vmul.f32 %v577_v49, %v1392_v51 }
 0x117   : > { %1179 = vtanh.f32 %v538_v53  ;;  %1102 = vmatmul.mubr.bf16.vlgmr.msra.gmra.mxu1 %v606_v54  ;;  %v578_v26 = vmul.f32 0.5, %v562_v56  ;;  %v567_v6 = vadd.f32 1.0, %v1166_v57 }
 0x118   : > { %v1168_v60 = vpop.eup %1167  ;;  %v596_v62 = vmul.f32 %v580_v38, %v1396_v55  ;;  %v595_v3 = vmul.f32 %v579_v59, %v1385_v44 }
 0x119   : > { %v594_v33 = vmul.f32 %v578_v26, %v1405_v63  ;;  %v565_v0 = vadd.f32 1.0, %v1168_v60  ;;  %v583_v51 = vmul.f32 0.5, %v567_v6 }
 0x11a   : > { %v608_v9 = vpack.c.bf16 %v596_v62, %v595_v3 }
 0x11b   : > { %v1170_v1 = vpop.eup %1169  ;;  %v607_v2 = vpack.c.bf16 %v594_v33, %v593_v61  ;;  %v581_v11 = vmul.f32 0.5, %v565_v0  ;;  %v599_v24 = vmul.f32 %v583_v51, %v1412_v5 }
 0x11c   : > { %v568_v7 = vadd.f32 1.0, %v1170_v1 }
 0x11d   : > { %v1172_v8 = vpop.eup %1171  ;;  %1105 = vmatprep.mubr.bf16.mxu1 %v607_v2  ;;  %v597_v18 = vmul.f32 %v581_v11, %v1419_v13 }
 0x11e   : > { %v566_v10 = vadd.f32 1.0, %v1172_v8  ;;  %v584_v12 = vmul.f32 0.5, %v568_v7 }
 0x11f   : > { %v1174_v14 = vpop.eup %1173  ;;  %1106 = vmatmul.mubr.bf16.gmra.mxu1 %v608_v9 }
 0x120   : > { %v1176_v15 = vpop.eup %1175  ;;  %v582_v63 = vmul.f32 0.5, %v566_v10  ;;  %v600_v55 = vmul.f32 %v584_v12, %v1427_v22  ;;  %v571_v19 = vadd.f32 1.0, %v1174_v14 }
 0x121   : > { %v569_v16 = vadd.f32 1.0, %v1176_v15 }
 0x122   : > { %v1178_v17 = vpop.eup %1177  ;;  %v598_v44 = vmul.f32 %v582_v63, %v1434_v32  ;;  %v610_v25 = vpack.c.bf16 %v600_v55, %v599_v24  ;;  %v587_v22 = vmul.f32 0.5, %v571_v19 }
 0x123   : > { %v572_v20 = vadd.f32 1.0, %v1178_v17  ;;  %v585_v28 = vmul.f32 0.5, %v569_v16  ;;  %v781_v16 = vlaneseq }
 0x124   : > { %v1180_v21 = vpop.eup %1179  ;;  %v609_v23 = vpack.c.bf16 %v598_v44, %v597_v18  ;;  %v603_v5 = vmul.f32 %v587_v22, %v1441_v42 }
 0x125   : > { %v570_v27 = vadd.f32 1.0, %v1180_v21  ;;  %v588_v30 = vmul.f32 0.5, %v572_v20  ;;  %v601_v34 = vmul.f32 %v585_v28, %v1445_v47  ;;  %v1548_v28 = vand.u32 127, %v781_v16 }
 0x126   : > { %1109 = vmatprep.mubr.bf16.mxu1 %v609_v23 }
 0x127   : > { %1110 = vmatmul.mubr.bf16.gmra.mxu1 %v610_v25  ;;  %v586_v31 = vmul.f32 0.5, %v570_v27  ;;  %v604_v32 = vmul.f32 %v588_v30, %v1453_v58  ;;  %vm783_vm0 = vcmp.eq.s32.totalorder %v1548_v28, 4 }
 0x129   : > { %v602_v13 = vmul.f32 %v586_v31, %v1461_v4  ;;  %v612_v36 = vpack.c.bf16 %v604_v32, %v603_v5 }
 0x12b   : > { %v611_v35 = vpack.c.bf16 %v602_v13, %v601_v34 }
 0x12d   : > { %1113 = vmatprep.mubr.bf16.mxu1 %v611_v35 }
 0x12f   : > { %1114 = vmatmul.mubr.bf16.gmra.mxu1 %v612_v36 }
 0x1d7   : > { %v1103_v39 = vpop.f32.mrf.mxu1 }
 0x1d8   : > { %v1494_v40 = vadd.f32 %v1103_v39, %v1491_v37 }
 0x1d9   : > { %v718_v47 = vpop.f32.mrf.mxu1 }
 0x1da   : > { %v1005_v4 = vmul.f32 -1.442695, %v1494_v40  ;;  %v1498_v58 = vadd.f32 %v1491_v37, %v718_v47 }
 0x1db   : > { %v1104_v41 = vpop.f32.mrf.mxu1 }
 0x1dc   : > { %1181 = vpow2.f32 %v1005_v4  ;;  %v1003_v42 = vmul.f32 -1.442695, %v1498_v58  ;;  %v1502_v43 = vadd.f32 %v1104_v41, %v1491_v37 }
 0x1dd   : > { %v721_v29 = vpop.f32.mrf.mxu1 }
 0x1de   : > { %1183 = vpow2.f32 %v1003_v42  ;;  %v1006_v45 = vmul.f32 -1.442695, %v1502_v43  ;;  %v1506_v46 = vadd.f32 %v1491_v37, %v721_v29 }
 0x1df   : > { %v1107_v48 = vpop.f32.mrf.mxu1 }
 0x1e0   : > { %1185 = vpow2.f32 %v1006_v45  ;;  %v1004_v49 = vmul.f32 -1.442695, %v1506_v46  ;;  %v1510_v50 = vadd.f32 %v1107_v48, %v1491_v37 }
 0x1e1   : > { %v734_v52 = vpop.f32.mrf.mxu1 }
 0x1e2   : > { %1187 = vpow2.f32 %v1004_v49  ;;  %v1009_v53 = vmul.f32 -1.442695, %v1510_v50  ;;  %v1514_v54 = vadd.f32 %v1491_v37, %v734_v52 }
 0x1e3   : > { %v1108_v56 = vpop.f32.mrf.mxu1 }
 0x1e4   : > { %1189 = vpow2.f32 %v1009_v53  ;;  %v1007_v57 = vmul.f32 -1.442695, %v1514_v54  ;;  %v1518_v38 = vadd.f32 %v1108_v56, %v1491_v37 }
 0x1e5   : > { %v737_v26 = vpop.f32.mrf.mxu1 }
 0x1e6   : > { %1191 = vpow2.f32 %v1007_v57  ;;  %v1010_v59 = vmul.f32 -1.442695, %v1518_v38  ;;  %v1522_v60 = vadd.f32 %v1491_v37, %v737_v26 }
 0x1e7   : > { %v1111_v61 = vpop.f32.mrf.mxu1 }
 0x1e8   : > { %1193 = vpow2.f32 %v1010_v59  ;;  %v1008_v33 = vmul.f32 -1.442695, %v1522_v60  ;;  %v1526_v62 = vadd.f32 %v1111_v61, %v1491_v37 }
 0x1e9   : > { %v1182_v0 = vpop.eup %1181  ;;  %v750_v1 = vpop.f32.mrf.mxu1 }
 0x1ea   : > { %v834_v2 = vadd.f32 1.0, %v1182_v0  ;;  %1195 = vpow2.f32 %v1008_v33  ;;  %v1013_v3 = vmul.f32 -1.442695, %v1526_v62  ;;  %v1530_v6 = vadd.f32 %v1491_v37, %v750_v1 }
 0x1eb   : > { %v1184_v7 = vpop.eup %1183  ;;  %v1112_v8 = vpop.f32.mrf.mxu1 }
 0x1ec   : > { %1197 = vrcp.f32 %v834_v2  ;;  %v832_v9 = vadd.f32 1.0, %v1184_v7  ;;  %v1011_v10 = vmul.f32 -1.442695, %v1530_v6  ;;  %v1534_v11 = vadd.f32 %v1112_v8, %v1491_v37 }
 0x1ed   : > { %v1186_v12 = vpop.eup %1185  ;;  %1199 = vpow2.f32 %v1013_v3  ;;  %v753_v14 = vpop.f32.mrf.mxu1 }
 0x1ee   : > { %1201 = vrcp.f32 %v832_v9  ;;  %v835_v51 = vadd.f32 1.0, %v1186_v12  ;;  %v1014_v15 = vmul.f32 -1.442695, %v1534_v11  ;;  %v1538_v63 = vadd.f32 %v1491_v37, %v753_v14 }
 0x1ef   : > { %v1188_v55 = vpop.eup %1187  ;;  %1203 = vpow2.f32 %v1011_v10  ;;  %v1115_v17 = vpop.f32.mrf.mxu1 }
 0x1f0   : > { %1205 = vrcp.f32 %v835_v51  ;;  %v833_v18 = vadd.f32 1.0, %v1188_v55  ;;  %v1012_v44 = vmul.f32 -1.442695, %v1538_v63  ;;  %v1542_v24 = vadd.f32 %v1115_v17, %v1491_v37 }
 0x1f1   : > { %v1190_v19 = vpop.eup %1189  ;;  %1207 = vpow2.f32 %v1014_v15  ;;  %v766_v20 = vpop.f32.mrf.mxu1 }
 0x1f2   : > { %1209 = vrcp.f32 %v833_v18  ;;  %v838_v21 = vadd.f32 1.0, %v1190_v19  ;;  %v1017_v23 = vmul.f32 -1.442695, %v1542_v24  ;;  %v1546_v25 = vadd.f32 %v1491_v37, %v766_v20 }
 0x1f3   : > { %v1192_v27 = vpop.eup %1191  ;;  %1211 = vpow2.f32 %v1012_v44  ;;  %v1116_v30 = vpop.f32.mrf.mxu1 }
 0x1f4   : > { %1213 = vrcp.f32 %v838_v21  ;;  %v836_v31 = vadd.f32 1.0, %v1192_v27  ;;  %v1015_v22 = vmul.f32 -1.442695, %v1546_v25  ;;  %v1552_v34 = vadd.f32 %v1116_v30, %v1491_v37 }
 0x1f5   : > { %v1194_v13 = vpop.eup %1193  ;;  %1215 = vpow2.f32 %v1017_v23  ;;  %v769_v32 = vpop.f32.mrf.mxu1 }
 0x1f6   : > { %1217 = vrcp.f32 %v836_v31  ;;  %v839_v35 = vadd.f32 1.0, %v1194_v13  ;;  %v1018_v5 = vmul.f32 -1.442695, %v1552_v34  ;;  %v1557_v36 = vadd.f32 %v1491_v37, %v769_v32 }
 0x1f7   : > { %v1196_v39 = vpop.eup %1195  ;;  %1219 = vpow2.f32 %v1015_v22 }
 0x1f8   : > { %1221 = vrcp.f32 %v839_v35  ;;  %v837_v47 = vadd.f32 1.0, %v1196_v39  ;;  %v1016_v4 = vmul.f32 -1.442695, %v1557_v36 }
 0x1f9   : > { %v1198_v41 = vpop.eup %1197  ;;  %1223 = vpow2.f32 %v1018_v5 }
 0x1fa   : > { %v1200_v42 = vpop.eup %1199  ;;  %v882_v37 = vsel %vm783_vm0, %v1198_v41, %v1494_v40  ;;  %1225 = vrcp.f32 %v837_v47 }
 0x1fb   : > { %v1202_v29 = vpop.eup %1201  ;;  %898 = vst [vmem:[%s1563_s16 + $0x10] sm:$0xff] %v882_v37  ;;  %v842_v45 = vadd.f32 1.0, %v1200_v42  ;;  %1227 = vpow2.f32 %v1016_v4 }
 0x1fc   : > { %v1204_v48 = vpop.eup %1203  ;;  %v880_v49 = vsel %vm783_vm0, %v1202_v29, %v1498_v58 }
 0x1fd   : > { %v1206_v52 = vpop.eup %1205  ;;  %896 = vst [vmem:[%s1563_s16] sm:$0xff] %v880_v49  ;;  %1229 = vrcp.f32 %v842_v45  ;;  %v840_v53 = vadd.f32 1.0, %v1204_v48 }
 0x1fe   : > { %v1208_v56 = vpop.eup %1207  ;;  %v883_v40 = vsel %vm783_vm0, %v1206_v52, %v1502_v43 }
 0x1ff   : > { %v1210_v57 = vpop.eup %1209  ;;  %899 = vst [vmem:[%s1563_s16 + $0x18] sm:$0xff] %v883_v40  ;;  %1231 = vrcp.f32 %v840_v53  ;;  %v843_v26 = vadd.f32 1.0, %v1208_v56 }
 0x200   : > { %v1212_v59 = vpop.eup %1211  ;;  %v881_v58 = vsel %vm783_vm0, %v1210_v57, %v1506_v46 }
 0x201   : > { %v1214_v61 = vpop.eup %1213  ;;  %897 = vst [vmem:[%s1563_s16 + $0x8] sm:$0xff] %v881_v58  ;;  %1233 = vrcp.f32 %v843_v26  ;;  %v841_v33 = vadd.f32 1.0, %v1212_v59 }
 0x202   : > { %v1216_v0 = vpop.eup %1215  ;;  %v886_v43 = vsel %vm783_vm0, %v1214_v61, %v1510_v50 }
 0x203   : > { %v1218_v1 = vpop.eup %1217  ;;  %902 = vst [vmem:[%s1563_s16 + $0x30] sm:$0xff] %v886_v43  ;;  %1235 = vrcp.f32 %v841_v33  ;;  %v846_v2 = vadd.f32 1.0, %v1216_v0 }
 0x204   : > { %v1220_v3 = vpop.eup %1219  ;;  %v884_v46 = vsel %vm783_vm0, %v1218_v1, %v1514_v54 }
 0x205   : > { %v1222_v7 = vpop.eup %1221  ;;  %900 = vst [vmem:[%s1563_s16 + $0x20] sm:$0xff] %v884_v46  ;;  %1237 = vrcp.f32 %v846_v2  ;;  %v844_v8 = vadd.f32 1.0, %v1220_v3 }
 0x206   : > { %v1224_v9 = vpop.eup %1223  ;;  %v887_v50 = vsel %vm783_vm0, %v1222_v7, %v1518_v38 }
 0x207   : > { %v1226_v10 = vpop.eup %1225  ;;  %903 = vst [vmem:[%s1563_s16 + $0x38] sm:$0xff] %v887_v50  ;;  %1239 = vrcp.f32 %v844_v8  ;;  %v847_v12 = vadd.f32 1.0, %v1224_v9 }
 0x208   : > { %v1228_v14 = vpop.eup %1227  ;;  %v885_v54 = vsel %vm783_vm0, %v1226_v10, %v1522_v60 }
 0x209   : > { %901 = vst [vmem:[%s1563_s16 + $0x28] sm:$0xff] %v885_v54  ;;  %1241 = vrcp.f32 %v847_v12  ;;  %v845_v51 = vadd.f32 1.0, %v1228_v14 }
 0x20a   : > { %v1230_v15 = vpop.eup %1229 }
 0x20b   : > { %v890_v38 = vsel %vm783_vm0, %v1230_v15, %v1526_v62  ;;  %1243 = vrcp.f32 %v845_v51 }
 0x20c   : > { %v1232_v55 = vpop.eup %1231  ;;  %906 = vst [vmem:[%s1563_s16 + $0x50] sm:$0xff] %v890_v38 }
 0x20d   : > { %v888_v16 = vsel %vm783_vm0, %v1232_v55, %v1530_v6 }
 0x20e   : > { %v1234_v17 = vpop.eup %1233  ;;  %904 = vst [vmem:[%s1563_s16 + $0x40] sm:$0xff] %v888_v16 }
 0x20f   : > { %v891_v60 = vsel %vm783_vm0, %v1234_v17, %v1534_v11 }
 0x210   : > { %v1236_v18 = vpop.eup %1235  ;;  %907 = vst [vmem:[%s1563_s16 + $0x58] sm:$0xff] %v891_v60 }
 0x211   : > { %v889_v62 = vsel %vm783_vm0, %v1236_v18, %v1538_v63 }
 0x212   : > { %v1238_v44 = vpop.eup %1237  ;;  %905 = vst [vmem:[%s1563_s16 + $0x48] sm:$0xff] %v889_v62 }
 0x213   : > { %v894_v6 = vsel %vm783_vm0, %v1238_v44, %v1542_v24 }
 0x214   : > { %v1240_v19 = vpop.eup %1239  ;;  %910 = vst [vmem:[%s1563_s16 + $0x70] sm:$0xff] %v894_v6 }
 0x215   : > { %v892_v20 = vsel %vm783_vm0, %v1240_v19, %v1546_v25 }
 0x216   : > { %v1242_v11 = vpop.eup %1241  ;;  %908 = vst [vmem:[%s1563_s16 + $0x60] sm:$0xff] %v892_v20 }
 0x217   : > { %v895_v21 = vsel %vm783_vm0, %v1242_v11, %v1552_v34 }
 0x218   : > { %v1244_v23 = vpop.eup %1243  ;;  %911 = vst [vmem:[%s1563_s16 + $0x78] sm:$0xff] %v895_v21 }
 0x219   : > { %v893_v63 = vsel %vm783_vm0, %v1244_v23, %v1557_v36 }
 0x21a   : > { %909 = vst [vmem:[%s1563_s16 + $0x68] sm:$0xff] %v893_v63 }
 0x21b PF: > { %s15_s18 = sadd.s32 1, %s1251_s18  }
 0x21c   : > { %p12_p4 = scmp.ge.s32.totalorder %s15_s18, 4  }
 0x21e   :  { %14 = sbr.rel (!%p12_p4) target bundleno = 1 (0x1), region = 70 }

</bundles_post_ra>
